<compile_context>
chip_gen: v5e
topology: v5e:2x2
jax: 0.10.0
libtpu: 0.0.40
codegen_flags: <defaults>
</compile_context>

<pallas_src>
import functools

import jax
import jax.numpy as jnp
from jax.experimental import pallas as pl
from jax.experimental.pallas import tpu as pltpu

LANE = 128


def _round_up(x, m):
    return ((x + m - 1) // m) * m


def _pick_row_tile(hw):
    # Largest row tile (multiple of 8) that divides the per-image spatial size.
    for cand in (512, 256, 128, 64, 32, 16, 8):
        if hw % cand == 0:
            return cand
    raise ValueError(f"feature-map size {hw} must be a multiple of 8")


# ----------------------------------------------------------------------------
# Fused Pallas kernel: backbone conv + mask_mold + soft_attention + classifier
# ----------------------------------------------------------------------------

def _make_fused_kernel(inv_hw):
    def kernel(patches_ref, p_ref, o_ref, mw_ref, mb_ref,
               cw_ref, cb_ref, clsw_ref, clsb_ref,
               out_ref, pooled_ref):
        b = pl.program_id(0)          # batch index
        j = pl.program_id(1)          # row-tile index within the image
        nb = pl.num_programs(0)
        nj = pl.num_programs(1)

        # Zero the pooled-sum accumulator once, at the very first grid step.
        @pl.when(jnp.logical_and(b == 0, j == 0))
        def _():
            pooled_ref[...] = jnp.zeros_like(pooled_ref)

        # --- backbone: conv realized as im2col matmul on the MXU, bias + ReLU ---
        feat = jnp.dot(patches_ref[...], cw_ref[...],
                       preferred_element_type=jnp.float32)          # [tm, Cp]
        feat = jnp.maximum(feat + cb_ref[...], 0.0)

        # --- mask_mold: 1x1 conv (2 -> 1 channel) + sigmoid (scalar params in SMEM) ---
        logits = p_ref[...] * mw_ref[0] + o_ref[...] * mw_ref[1] + mb_ref[0]   # [tm, 1]
        soft = jax.nn.sigmoid(logits)

        # --- soft_attention: gate backbone features with the soft mask ---
        att = feat * soft                                            # [tm, Cp]

        # --- classifier_head (part 1): accumulate global-average-pool sums ---
        tile_sum = jnp.sum(att, axis=0, keepdims=True)               # [1, Cp]
        row_ids = jax.lax.broadcasted_iota(jnp.int32, pooled_ref.shape, 0)
        onehot = (row_ids == b).astype(jnp.float32)                  # [Bp, Cp]
        pooled_ref[...] += onehot * tile_sum

        # --- classifier_head (part 2): linear layer on the last grid step ---
        @pl.when(jnp.logical_and(b == nb - 1, j == nj - 1))
        def _():
            pooled_mean = pooled_ref[...] * inv_hw                   # [Bp, Cp]
            out_ref[...] = (jnp.dot(pooled_mean, clsw_ref[...],
                                    preferred_element_type=jnp.float32)
                            + clsb_ref[...])                         # [Bp, Np]

    return kernel


def fused_vrb_kernel(patches_pad, person_col, obj_col,
                     mold_w, mold_b, conv_w_pad, conv_b_pad,
                     cls_w_pad, cls_b_pad, *, B, HW, tm):
    M, Kp = patches_pad.shape
    Cp = conv_w_pad.shape[1]
    Np = cls_w_pad.shape[1]
    Bp = _round_up(max(B, 1), 8)
    nj = HW // tm
    inv_hw = 1.0 / float(HW)

    row_map = lambda b, j: (b * nj + j, 0)
    full_map = lambda b, j: (0, 0)

    return pl.pallas_call(
        _make_fused_kernel(inv_hw),
        out_shape=jax.ShapeDtypeStruct((Bp, Np), jnp.float32),
        grid=(B, nj),
        in_specs=[
            pl.BlockSpec((tm, Kp), row_map),                         # im2col patches
            pl.BlockSpec((tm, 1), row_map),                          # person mask column
            pl.BlockSpec((tm, 1), row_map),                          # obj mask column
            pl.BlockSpec(memory_space=pltpu.MemorySpace.SMEM),       # mold_w (2,)
            pl.BlockSpec(memory_space=pltpu.MemorySpace.SMEM),       # mold_b (1,)
            pl.BlockSpec((Kp, Cp), full_map),                        # conv weights (padded)
            pl.BlockSpec((1, Cp), full_map),                         # conv bias (padded)
            pl.BlockSpec((Cp, Np), full_map),                        # classifier weights
            pl.BlockSpec((1, Np), full_map),                         # classifier bias
        ],
        out_specs=pl.BlockSpec((Bp, Np), full_map),
        scratch_shapes=[pltpu.VMEM((Bp, Cp), jnp.float32)],          # pooled-sum accumulator
        compiler_params=pltpu.CompilerParams(
            # Output block and pooled accumulator are shared across the whole grid,
            # so both axes must stay sequential ("arbitrary").
            dimension_semantics=("arbitrary", "arbitrary")),
    )(patches_pad, person_col, obj_col, mold_w, mold_b,
      conv_w_pad, conv_b_pad, cls_w_pad, cls_b_pad)


# ----------------------------------------------------------------------------
# JAX glue: layout conversion, im2col, mask downsampling, lane padding
# ----------------------------------------------------------------------------

def im2col_3x3_s2_p1(x_nhwc):
    # TODO(synk): at real backbone resolutions, replace this XLA-side im2col
    # (9x HBM blow-up) with in-kernel shifted-slice matmuls or lax.conv.
    B, H, W, C = x_nhwc.shape
    k, stride, pad = 3, 2, 1
    xp = jnp.pad(x_nhwc, ((0, 0), (pad, pad), (pad, pad), (0, 0)))
    Ho = (H + 2 * pad - k) // stride + 1
    Wo = (W + 2 * pad - k) // stride + 1
    cols = []
    for dy in range(k):
        for dx in range(k):
            cols.append(xp[:, dy:dy + stride * Ho:stride,
                           dx:dx + stride * Wo:stride, :])           # [B, Ho, Wo, C]
    patches = jnp.stack(cols, axis=3)                                # [B, Ho, Wo, k*k, C]
    return patches.reshape(B * Ho * Wo, k * k * C), Ho, Wo


def avgpool2x2_nhwc(x):
    B, H, W, C = x.shape
    return x.reshape(B, H // 2, 2, W // 2, 2, C).mean(axis=(2, 4))


def init_params(key, cin=4, cout=32, n_classes=5):
    k1, k2, k3, k4 = jax.random.split(key, 4)
    return {
        # backbone 3x3 conv, stored as im2col matmul weights (rows = (dy,dx,cin)).
        "conv_w": jax.random.normal(k1, (3 * 3 * cin, cout), jnp.float32) * 0.1,
        "conv_b": jnp.zeros((1, cout), jnp.float32),
        # mask_mold 1x1 conv 2 -> 1 channel (1-D scalars, live in SMEM in-kernel).
        "mold_w": jax.random.normal(k2, (2,), jnp.float32) * 0.5,
        "mold_b": jnp.zeros((1,), jnp.float32),
        # classifier head: linear cout -> n_classes.
        "cls_w": jax.random.normal(k3, (cout, n_classes), jnp.float32) * 0.1,
        "cls_b": jax.random.normal(k4, (1, n_classes), jnp.float32) * 0.01,
    }


def vrb_forward(params, img, person, obj, targets=None, training=False):
    if training and targets is None:
        raise ValueError("In training mode, targets should be passed")

    B = img.shape[0]

    # backbone input: NCHW -> NHWC, im2col for the stride-2 3x3 conv.
    img_nhwc = jnp.transpose(img, (0, 2, 3, 1)).astype(jnp.float32)
    patches, Ho, Wo = im2col_3x3_s2_p1(img_nhwc)                     # [B*HW, 9*Cin]
    HW = Ho * Wo
    M, K = patches.shape

    # mask_transform: downsample person/obj masks to feature resolution.
    person_ds = avgpool2x2_nhwc(jnp.transpose(person, (0, 2, 3, 1)).astype(jnp.float32))
    obj_ds = avgpool2x2_nhwc(jnp.transpose(obj, (0, 2, 3, 1)).astype(jnp.float32))
    person_col = person_ds.reshape(M, 1)
    obj_col = obj_ds.reshape(M, 1)

    # Lane-dense zero padding (free FLOPs on the MXU, removes masked loads/stores).
    cout = params["conv_w"].shape[1]
    n_classes = params["cls_w"].shape[1]
    Kp = _round_up(K, LANE)
    Cp = _round_up(cout, LANE)
    Np = _round_up(n_classes, LANE)

    patches_pad = jnp.pad(patches, ((0, 0), (0, Kp - K)))
    conv_w_pad = jnp.pad(params["conv_w"], ((0, Kp - K), (0, Cp - cout)))
    conv_b_pad = jnp.pad(params["conv_b"], ((0, 0), (0, Cp - cout)))
    cls_w_pad = jnp.pad(params["cls_w"], ((0, Cp - cout), (0, Np - n_classes)))
    cls_b_pad = jnp.pad(params["cls_b"], ((0, 0), (0, Np - n_classes)))

    # NOTE: on v6e/v7x, cast patches/conv_w to bf16 (keep f32 accumulation) once
    # sizes grow; kept f32 here to match the reference bit-for-bit at toy size.
    tm = _pick_row_tile(HW)
    out_pad = fused_vrb_kernel(patches_pad, person_col, obj_col,
                               params["mold_w"], params["mold_b"],
                               conv_w_pad, conv_b_pad, cls_w_pad, cls_b_pad,
                               B=B, HW=HW, tm=tm)

    predictions = out_pad[:B, :n_classes]

    # TODO(synk): targets post-processing depends on the injected sub-modules
    # (not defined in the reference); passed through unchanged.
    return predictions, targets


# Pure-JAX reference (same glue, XLA compute) for correctness verification.
def vrb_reference(params, img, person, obj):
    B = img.shape[0]
    img_nhwc = jnp.transpose(img, (0, 2, 3, 1)).astype(jnp.float32)
    patches, Ho, Wo = im2col_3x3_s2_p1(img_nhwc)
    feat = jnp.maximum(patches @ params["conv_w"] + params["conv_b"], 0.0)
    p = avgpool2x2_nhwc(jnp.transpose(person, (0, 2, 3, 1)).astype(jnp.float32)).reshape(-1, 1)
    o = avgpool2x2_nhwc(jnp.transpose(obj, (0, 2, 3, 1)).astype(jnp.float32)).reshape(-1, 1)
    logits = p * params["mold_w"][0] + o * params["mold_w"][1] + params["mold_b"][0]
    att = feat * jax.nn.sigmoid(logits)
    pooled = att.reshape(B, Ho * Wo, -1).mean(axis=1)
    return pooled @ params["cls_w"] + params["cls_b"]


if __name__ == "__main__":
    key = jax.random.PRNGKey(0)
    kp, ki, kper, kobj = jax.random.split(key, 4)

    params = init_params(kp, cin=4, cout=32, n_classes=5)

    img = jax.random.normal(ki, (2, 4, 16, 16), jnp.float32)         # NCHW, like PyTorch
    person = (jax.random.uniform(kper, (2, 1, 16, 16)) > 0.5).astype(jnp.float32)
    obj = (jax.random.uniform(kobj, (2, 1, 16, 16)) > 0.5).astype(jnp.float32)

    preds, targets = vrb_forward(params, img, person, obj, targets=None, training=False)
    jax.block_until_ready(preds)

    assert preds.shape == (2, 5) and preds.dtype == jnp.float32

    ref = vrb_reference(params, img, person, obj)
    assert bool(jnp.allclose(preds, ref, rtol=1e-2, atol=1e-2)), "mismatch vs pure-JAX reference"

    print("KERNEL_OK")
</pallas_src>

<mosaic_0001>
module attributes {stable_mosaic.version = 11 : i64} {
  func.func @kernel(%arg0: i32, %arg1: i32, %arg2: memref<64x128xf32, #tpu.memory_space<vmem>>, %arg3: memref<64x1xf32, #tpu.memory_space<vmem>>, %arg4: memref<64x1xf32, #tpu.memory_space<vmem>>, %arg5: memref<2xf32, #tpu.memory_space<smem>>, %arg6: memref<1xf32, #tpu.memory_space<smem>>, %arg7: memref<128x128xf32, #tpu.memory_space<vmem>>, %arg8: memref<1x128xf32, #tpu.memory_space<vmem>>, %arg9: memref<128x128xf32, #tpu.memory_space<vmem>>, %arg10: memref<1x128xf32, #tpu.memory_space<vmem>>, %arg11: memref<8x128xf32, #tpu.memory_space<vmem>>, %arg12: memref<8x128xf32, #tpu.memory_space<vmem>>) attributes {dimension_semantics = [#tpu.dimension_semantics<arbitrary>, #tpu.dimension_semantics<arbitrary>], iteration_bounds = array<i64: 2, 1>, scalar_prefetch = 0 : i64, scratch_operands = 1 : i64, tpu.core_type = #tpu.core_type<tc>, window_params = [{transform_indices = @transform_0, window_bounds = array<i64: 64, 128>}, {transform_indices = @transform_1, window_bounds = array<i64: 64, 1>}, {transform_indices = @transform_2, window_bounds = array<i64: 64, 1>}, {transform_indices = @transform_3, window_bounds = array<i64: 2>}, {transform_indices = @transform_4, window_bounds = array<i64: 1>}, {pipeline_mode = #tpu.pipeline_mode<synchronous>, transform_indices = @transform_5, window_bounds = array<i64: 128, 128>}, {pipeline_mode = #tpu.pipeline_mode<synchronous>, transform_indices = @transform_6, window_bounds = array<i64: 1, 128>}, {pipeline_mode = #tpu.pipeline_mode<synchronous>, transform_indices = @transform_7, window_bounds = array<i64: 128, 128>}, {pipeline_mode = #tpu.pipeline_mode<synchronous>, transform_indices = @transform_8, window_bounds = array<i64: 1, 128>}, {pipeline_mode = #tpu.pipeline_mode<synchronous>, transform_indices = @transform_9, window_bounds = array<i64: 8, 128>}]} {
    %c0_i32 = arith.constant 0 : i32
    %0 = arith.cmpi eq, %arg0, %c0_i32 : i32
    %c0_i32_0 = arith.constant 0 : i32
    %1 = arith.cmpi eq, %arg1, %c0_i32_0 : i32
    %2 = arith.andi %0, %1 : i1
    %3 = arith.extui %2 : i1 to i32
    %c0_i32_1 = arith.constant 0 : i32
    %4 = arith.cmpi ne, %3, %c0_i32_1 : i32
    scf.if %4 {
      %cst_22 = arith.constant 0.000000e+00 : f32
      %49 = vector.broadcast %cst_22 : f32 to vector<8x128xf32>
      %c0_23 = arith.constant 0 : index
      %c0_24 = arith.constant 0 : index
      %50 = vector.load %arg12[%c0_23, %c0_24] : memref<8x128xf32, #tpu.memory_space<vmem>>, vector<8x128xf32>
      tpu.vector_store %arg12[%c0_23, %c0_24], %49 {strides = array<i32>} : memref<8x128xf32, #tpu.memory_space<vmem>>, vector<8x128xf32>,
    } else {
    }
    %c0 = arith.constant 0 : index
    %c0_2 = arith.constant 0 : index
    %5 = vector.load %arg2[%c0, %c0_2] : memref<64x128xf32, #tpu.memory_space<vmem>>, vector<64x128xf32>
    %c0_3 = arith.constant 0 : index
    %c0_4 = arith.constant 0 : index
    %6 = vector.load %arg7[%c0_3, %c0_4] : memref<128x128xf32, #tpu.memory_space<vmem>>, vector<128x128xf32>
    %cst = arith.constant dense<0.000000e+00> : vector<64x128xf32>
    %7 = tpu.matmul %5, %6, %cst {dimension_numbers = #tpu.dot_dimension_numbers<[1], [0], [0], [1], [0, 0, 1, 1], [], []>} : vector<64x128xf32>, vector<128x128xf32>, vector<64x128xf32> -> vector<64x128xf32>
    %c0_5 = arith.constant 0 : index
    %c0_6 = arith.constant 0 : index
    %8 = vector.load %arg8[%c0_5, %c0_6] : memref<1x128xf32, #tpu.memory_space<vmem>>, vector<1x128xf32>
    %9 = vector.broadcast %8 : vector<1x128xf32> to vector<64x128xf32>
    %10 = arith.addf %7, %9 : vector<64x128xf32>
    %cst_7 = arith.constant 0.000000e+00 : f32
    %11 = vector.broadcast %cst_7 : f32 to vector<64x128xf32>
    %12 = arith.maximumf %10, %11 : vector<64x128xf32>
    %c0_8 = arith.constant 0 : index
    %c0_9 = arith.constant 0 : index
    %13 = vector.load %arg3[%c0_8, %c0_9] : memref<64x1xf32, #tpu.memory_space<vmem>>, vector<64x1xf32>
    %c0_10 = arith.constant 0 : index
    %14 = memref.load %arg5[%c0_10] : memref<2xf32, #tpu.memory_space<smem>>
    %15 = vector.broadcast %14 : f32 to vector<64x1xf32>
    %16 = arith.mulf %13, %15 : vector<64x1xf32>
    %c0_11 = arith.constant 0 : index
    %c0_12 = arith.constant 0 : index
    %17 = vector.load %arg4[%c0_11, %c0_12] : memref<64x1xf32, #tpu.memory_space<vmem>>, vector<64x1xf32>
    %c1 = arith.constant 1 : index
    %18 = memref.load %arg5[%c1] : memref<2xf32, #tpu.memory_space<smem>>
    %19 = vector.broadcast %18 : f32 to vector<64x1xf32>
    %20 = arith.mulf %17, %19 : vector<64x1xf32>
    %21 = arith.addf %16, %20 : vector<64x1xf32>
    %c0_13 = arith.constant 0 : index
    %22 = memref.load %arg6[%c0_13] : memref<1xf32, #tpu.memory_space<smem>>
    %23 = vector.broadcast %22 : f32 to vector<64x1xf32>
    %24 = arith.addf %21, %23 : vector<64x1xf32>
    %25 = arith.negf %24 : vector<64x1xf32>
    %26 = math.exp %25 : vector<64x1xf32>
    %cst_14 = arith.constant 1.000000e+00 : f32
    %27 = vector.broadcast %cst_14 : f32 to vector<64x1xf32>
    %28 = arith.addf %27, %26 : vector<64x1xf32>
    %29 = arith.divf %27, %28 : vector<64x1xf32>
    %30 = vector.broadcast %29 : vector<64x1xf32> to vector<64x128xf32>
    %31 = arith.mulf %12, %30 : vector<64x128xf32>
    %cst_15 = arith.constant dense<0.000000e+00> : vector<128xf32>
    %32 = vector.multi_reduction <add>, %31, %cst_15 [0] : vector<64x128xf32> to vector<128xf32>
    %33 = vector.shape_cast %32 : vector<128xf32> to vector<1x128xf32>
    %34 = tpu.iota {dimensions = array<i32: 0>} : vector<8x128xi32>
    %35 = vector.broadcast %arg0 : i32 to vector<8x128xi32>
    %36 = arith.cmpi eq, %34, %35 : vector<8x128xi32>
    %37 = arith.extui %36 : vector<8x128xi1> to vector<8x128xi32>
    %38 = arith.sitofp %37 : vector<8x128xi32> to vector<8x128xf32>
    %c0_16 = arith.constant 0 : index
    %c0_17 = arith.constant 0 : index
    %39 = vector.load %arg12[%c0_16, %c0_17] : memref<8x128xf32, #tpu.memory_space<vmem>>, vector<8x128xf32>
    %40 = vector.broadcast %33 : vector<1x128xf32> to vector<8x128xf32>
    %41 = arith.mulf %38, %40 : vector<8x128xf32>
    %42 = arith.addf %39, %41 : vector<8x128xf32>
    %c0_18 = arith.constant 0 : index
    %c0_19 = arith.constant 0 : index
    %43 = vector.load %arg12[%c0_18, %c0_19] : memref<8x128xf32, #tpu.memory_space<vmem>>, vector<8x128xf32>
    tpu.vector_store %arg12[%c0_18, %c0_19], %42 {strides = array<i32>} : memref<8x128xf32, #tpu.memory_space<vmem>>, vector<8x128xf32>,
    %c1_i32 = arith.constant 1 : i32
    %44 = arith.cmpi eq, %arg0, %c1_i32 : i32
    %c0_i32_20 = arith.constant 0 : i32
    %45 = arith.cmpi eq, %arg1, %c0_i32_20 : i32
    %46 = arith.andi %44, %45 : i1
    %47 = arith.extui %46 : i1 to i32
    %c0_i32_21 = arith.constant 0 : i32
    %48 = arith.cmpi ne, %47, %c0_i32_21 : i32
    scf.if %48 {
      %c0_22 = arith.constant 0 : index
      %c0_23 = arith.constant 0 : index
      %49 = vector.load %arg12[%c0_22, %c0_23] : memref<8x128xf32, #tpu.memory_space<vmem>>, vector<8x128xf32>
      %cst_24 = arith.constant 1.562500e-02 : f32
      %50 = vector.broadcast %cst_24 : f32 to vector<8x128xf32>
      %51 = arith.mulf %49, %50 : vector<8x128xf32>
      %c0_25 = arith.constant 0 : index
      %c0_26 = arith.constant 0 : index
      %52 = vector.load %arg9[%c0_25, %c0_26] : memref<128x128xf32, #tpu.memory_space<vmem>>, vector<128x128xf32>
      %cst_27 = arith.constant dense<0.000000e+00> : vector<8x128xf32>
      %53 = tpu.matmul %51, %52, %cst_27 {dimension_numbers = #tpu.dot_dimension_numbers<[1], [0], [0], [1], [0, 0, 1, 1], [], []>} : vector<8x128xf32>, vector<128x128xf32>, vector<8x128xf32> -> vector<8x128xf32>
      %c0_28 = arith.constant 0 : index
      %c0_29 = arith.constant 0 : index
      %54 = vector.load %arg10[%c0_28, %c0_29] : memref<1x128xf32, #tpu.memory_space<vmem>>, vector<1x128xf32>
      %55 = vector.broadcast %54 : vector<1x128xf32> to vector<8x128xf32>
      %56 = arith.addf %53, %55 : vector<8x128xf32>
      %c0_30 = arith.constant 0 : index
      %c0_31 = arith.constant 0 : index
      %57 = vector.load %arg11[%c0_30, %c0_31] : memref<8x128xf32, #tpu.memory_space<vmem>>, vector<8x128xf32>
      tpu.vector_store %arg11[%c0_30, %c0_31], %56 {strides = array<i32>} : memref<8x128xf32, #tpu.memory_space<vmem>>, vector<8x128xf32>,
    } else {
    }
    return
  }
  func.func @transform_0(%arg0: i32, %arg1: i32) -> (i32, i32) {
    %c1_i32 = arith.constant 1 : i32
    %0 = arith.muli %arg0, %c1_i32 : i32
    %1 = arith.addi %0, %arg1 : i32
    %c0_i32 = arith.constant 0 : i32
    %c0_i32_0 = arith.constant 0 : i32
    return %1, %c0_i32 : i32, i32
  }
  func.func @transform_1(%arg0: i32, %arg1: i32) -> (i32, i32) {
    %c1_i32 = arith.constant 1 : i32
    %0 = arith.muli %arg0, %c1_i32 : i32
    %1 = arith.addi %0, %arg1 : i32
    %c0_i32 = arith.constant 0 : i32
    %c0_i32_0 = arith.constant 0 : i32
    return %1, %c0_i32 : i32, i32
  }
  func.func @transform_2(%arg0: i32, %arg1: i32) -> (i32, i32) {
    %c1_i32 = arith.constant 1 : i32
    %0 = arith.muli %arg0, %c1_i32 : i32
    %1 = arith.addi %0, %arg1 : i32
    %c0_i32 = arith.constant 0 : i32
    %c0_i32_0 = arith.constant 0 : i32
    return %1, %c0_i32 : i32, i32
  }
  func.func @transform_3(%arg0: i32, %arg1: i32) -> i32 {
    %c0_i32 = arith.constant 0 : i32
    %c0_i32_0 = arith.constant 0 : i32
    return %c0_i32 : i32
  }
  func.func @transform_4(%arg0: i32, %arg1: i32) -> i32 {
    %c0_i32 = arith.constant 0 : i32
    %c0_i32_0 = arith.constant 0 : i32
    return %c0_i32 : i32
  }
  func.func @transform_5(%arg0: i32, %arg1: i32) -> (i32, i32) {
    %c0_i32 = arith.constant 0 : i32
    %c0_i32_0 = arith.constant 0 : i32
    %c0_i32_1 = arith.constant 0 : i32
    return %c0_i32, %c0_i32_0 : i32, i32
  }
  func.func @transform_6(%arg0: i32, %arg1: i32) -> (i32, i32) {
    %c0_i32 = arith.constant 0 : i32
    %c0_i32_0 = arith.constant 0 : i32
    %c0_i32_1 = arith.constant 0 : i32
    return %c0_i32, %c0_i32_0 : i32, i32
  }
  func.func @transform_7(%arg0: i32, %arg1: i32) -> (i32, i32) {
    %c0_i32 = arith.constant 0 : i32
    %c0_i32_0 = arith.constant 0 : i32
    %c0_i32_1 = arith.constant 0 : i32
    return %c0_i32, %c0_i32_0 : i32, i32
  }
  func.func @transform_8(%arg0: i32, %arg1: i32) -> (i32, i32) {
    %c0_i32 = arith.constant 0 : i32
    %c0_i32_0 = arith.constant 0 : i32
    %c0_i32_1 = arith.constant 0 : i32
    return %c0_i32, %c0_i32_0 : i32, i32
  }
  func.func @transform_9(%arg0: i32, %arg1: i32) -> (i32, i32) {
    %c0_i32 = arith.constant 0 : i32
    %c0_i32_0 = arith.constant 0 : i32
    %c0_i32_1 = arith.constant 0 : i32
    return %c0_i32, %c0_i32_0 : i32, i32
  }
}

</mosaic_0001>

<bundles_post_ra>
// kernel: tpu_custom_call.1
= control target key start
LH: loop header
LB: loop body
LE: loop exit
PB: predicated region body
PF: predicated region fallthrough
CT: control target
= control target key end

     0   :  { %s1683_s0 = inlined_call_operand.vmem [shape: f32[128,128], index: 0, kind: input, shape index: {}]   ;;  %s1684_s1 = inlined_call_operand.vmem [shape: f32[128,1], index: 1, kind: input, shape index: {}]   ;;  %s1685_s2 = inlined_call_operand.vmem [shape: f32[128,1], index: 2, kind: input, shape index: {}]   ;;  %s1686_s3 = inlined_call_operand.vmem [shape: f32[2], index: 3, kind: input, shape index: {}]   ;;  %s1687_s4 = inlined_call_operand.<no memory space> [shape: f32[1], index: 4, kind: input, shape index: {}]   ;;  %s1688_s5 = inlined_call_operand.vmem [shape: f32[128,128], index: 5, kind: input, shape index: {}]   ;;  %s1689_s6 = inlined_call_operand.vmem [shape: f32[1,128], index: 6, kind: input, shape index: {}]   ;;  %s1690_s7 = inlined_call_operand.hbm [shape: f32[128,128], index: 7, kind: input, shape index: {}]   ;;  %s1691_s8 = inlined_call_operand.vmem [shape: f32[1,128], index: 8, kind: input, shape index: {}]   ;;  %s1692_s9 = inlined_call_operand.hbm [shape: f32[8,128], index: 9, kind: output, shape index: {}]  }
   0x1   :  { %14 = sst [smem:[#allocation3]] %s1687_s4 }
   0x2   :  { %15 = vsyncpa [#allocation7], 0 }
   0x3   :  { %16 = vsyncpa [#allocation5], 0 }
   0x4   :  { %17 = vsyncpa [#allocation6], 0  ;;  %s1288_s11 = smov 0   ;;  %s1290_s12 = smov 0  }
   0x5   :  { %s1292_s13 = smov 0  }
   0x6 LB: > { %s944_s4 = sadd.s32 4294967295, %s1225_s13   ;;  %s35_s14 = sadd.s32 1, %s1221_s12  ;;  %s1225_s13 = sphi %s1292_s13, %s23_s13   ;;  %s1221_s12 = sphi %s1290_s12, %s1722_s12   ;;  %s1217_s11 = sphi %s1288_s11, %s1721_s11  }
   0x7   : > { %p37_p0 = scmp.ge.s32.totalorder %s35_s14, 2  ;;  %p945_p1 = scmp.ge.s32.totalorder %s1225_s13, 1 }
   0x8   : > { %p271_p2 = scmp.lt.s32.totalorder %s1225_s13, 3  ;;  %p1315_p4 = scmp.eq.s32.totalorder %s944_s4, 0 }
   0x9   : > { %s1724_s14 = smov (%p37_p0, %s35_s14), 0  ;;  %s283_s19 = sshll.u32 %s1686_s3, 4  ;;  %s284_s19 = int_to_ptr.vmem [resolvable:$true] %s283_s19 }
   0xa   : > { %p1309_p3 = pnand %p945_p1, %p271_p2  ;;  %s301_s22 = sshll.u32 %s1690_s7, 4  ;;  %s302_s22 = int_to_ptr.hbm [resolvable:$true] %s301_s22 }
   0xb   : > { %s1227_s23 = smov [#allocation8]   ;;  %s1228_s25 = smov [#allocation4]  }
   0xc   : > { %p1036_p5 = pneg %p1309_p3  ;;  %s303_s24 = sshll.u32 %s1227_s23, 4  ;;  %s304_s24 = int_to_ptr.vmem [resolvable:$true] %s303_s24 }
   0xd   : > { %s1229_s26 = smov 128   ;;  %s1230_s27 = smov 8  }
   0xe   : > { %p1037_p6 = pnand %p1315_p4, %p1036_p5  ;;  %355 = sbr.rel (%p1309_p3) target bundleno = 379 (0x17b), region = 56 }
  0x10   : > { %1039 = dma.vmem_to_smem (!%p1037_p6), %s284_s19, 16, %s1228_s25, [#allocation7]  }
  0x11   : > { %1042 = dma.hbm_to_vmem [thread:$0]  (!%p1037_p6), %s302_s22, 2048, %s304_s24, [#allocation5], %s1229_s26, %s1229_s26, %s1230_s27  }
  0x13   : > { %1204 = dma.done.wait (%p1315_p4), [#allocation7], 16  }
  0x14   : > { %1206 = vsyncadd (%p1315_p4), [#allocation7], 4294967280 }
  0x15   : > { %1208 = dma.done.wait (%p1315_p4), [#allocation5], 2048  }
  0x16   : > { %1210 = vsyncadd (%p1315_p4), [#allocation5], 4294965248 }
  0x17   : > { %367 = sfence }
  0x18   : > { %s952_s28 = sshll.u32 %s1217_s11, 3  ;;  %p430_p7 = scmp.eq.s32.totalorder %s1217_s11, 0 }
  0x19   : > { %p408_p8 = scmp.lt.s32.totalorder %s952_s28, 15  ;;  %v1231_v0 = vmov (%p430_p7), 0.0  }
  0x1a   : > { %435 = sbr.rel (!%p430_p7) target bundleno = 31 (0x1f), region = 68  ;;  %436 = vst [vmem:[#allocation2] sm:$0xff] (%p430_p7), %v1231_v0 }
  0x1b   : > { %s1726_s28 = smov (!%p408_p8, %s952_s28), 15 }
  0x1c   : > { %s953_s29 = sshll.u32 %s1726_s28, 3 }
  0x1d   : > { %s1344_s15 = scalar_lea.vmem %s1683_s0, %s953_s29  ;;  %s1349_s19 = scalar_lea.vmem %s1684_s1, %s953_s29 }
  0x1e   : > { %s1354_s21 = scalar_lea.vmem %s1685_s2, %s953_s29 }
  0x1f PF: > { %v460_v1 = vld [vmem:[%s1688_s5 + $0x78] sm:$0xff]  ;;  %v459_v2 = vld [vmem:[%s1688_s5 + $0x70] sm:$0xff]  ;;  %s522_s26 = sld [smem:[#allocation4]]  ;;  %v458_v3 = vld [vmem:[%s1688_s5 + $0x68] sm:$0xff]  ;;  %p791_p9 = scmp.eq.s32.totalorder %s1217_s11, 1 }
  0x20   : > { %465 = vmatpush.msra.mxu0 %v460_v1  ;;  %976 = vmatpush.msra.mxu1 %v460_v1  ;;  %s959_s27 = sld [smem:[#allocation4 + $0x1]]  ;;  %v457_v4 = vld [vmem:[%s1688_s5 + $0x60] sm:$0xff]  ;;  %v456_v5 = vld [vmem:[%s1688_s5 + $0x58] sm:$0xff]  ;;  %v455_v6 = vld [vmem:[%s1688_s5 + $0x50] sm:$0xff] }
  0x21   : > { %977 = vmatpush.msra.mxu2 %v460_v1  ;;  %978 = vmatpush.msra.mxu3 %v460_v1  ;;  %s1365_s30 = sld [smem:[#allocation3]]  ;;  %v516_v8 = vld [vmem:[%s1349_s19 + $0x10] sm:$0xff]  ;;  %v514_v11 = vld [vmem:[%s1349_s19] sm:$0xff]  ;;  %v517_v16 = vld [vmem:[%s1349_s19 + $0x18] sm:$0xff] }
  0x22   : > { %466 = vmatpush.msra.mxu0 %v459_v2  ;;  %979 = vmatpush.msra.mxu1 %v459_v2  ;;  %v534_v9 = vld [vmem:[%s1354_s21 + $0x10] sm:$0xff]  ;;  %v532_v15 = vld [vmem:[%s1354_s21] sm:$0xff]  ;;  %v535_v17 = vld [vmem:[%s1354_s21 + $0x18] sm:$0xff] }
  0x23   : > { %980 = vmatpush.msra.mxu2 %v459_v2  ;;  %981 = vmatpush.msra.mxu3 %v459_v2  ;;  %v454_v18 = vld [vmem:[%s1688_s5 + $0x48] sm:$0xff]  ;;  %v521_v26 = vld [vmem:[%s1349_s19 + $0x38] sm:$0xff]  ;;  %v520_v31 = vld [vmem:[%s1349_s19 + $0x30] sm:$0xff] }
  0x24   : > { %467 = vmatpush.msra.mxu0 %v458_v3  ;;  %982 = vmatpush.msra.mxu1 %v458_v3  ;;  %v515_v24 = vld [vmem:[%s1349_s19 + $0x8] sm:$0xff]  ;;  %v539_v30 = vld [vmem:[%s1354_s21 + $0x38] sm:$0xff]  ;;  %v538_v32 = vld [vmem:[%s1354_s21 + $0x30] sm:$0xff] }
  0x25   : > { %983 = vmatpush.msra.mxu2 %v458_v3  ;;  %984 = vmatpush.msra.mxu3 %v458_v3  ;;  %v1376_v7 = vstv %s522_s26  ;;  %v533_v25 = vld [vmem:[%s1354_s21 + $0x8] sm:$0xff]  ;;  %v453_v33 = vld [vmem:[%s1688_s5 + $0x40] sm:$0xff]  ;;  %v452_v42 = vld [vmem:[%s1688_s5 + $0x38] sm:$0xff] }
  0x26   : > { %468 = vmatpush.msra.mxu0 %v457_v4  ;;  %985 = vmatpush.msra.mxu1 %v457_v4  ;;  %v1380_v10 = vstv %s959_s27  ;;  %v526_v12 = vmul.f32 %v1376_v7, %v516_v8  ;;  %v524_v14 = vmul.f32 %v1376_v7, %v514_v11  ;;  %v527_v21 = vmul.f32 %v1376_v7, %v517_v16  ;;  %v518_v37 = vld [vmem:[%s1349_s19 + $0x20] sm:$0xff]  ;;  %v519_v47 = vld [vmem:[%s1349_s19 + $0x28] sm:$0xff]  ;;  %v451_v53 = vld [vmem:[%s1688_s5 + $0x30] sm:$0xff] }
  0x27   : > { %986 = vmatpush.msra.mxu2 %v457_v4  ;;  %987 = vmatpush.msra.mxu3 %v457_v4  ;;  %v544_v13 = vmul.f32 %v1380_v10, %v534_v9  ;;  %v1393_v19 = vstv %s1365_s30  ;;  %v542_v20 = vmul.f32 %v1380_v10, %v532_v15  ;;  %v545_v22 = vmul.f32 %v1380_v10, %v535_v17  ;;  %v536_v41 = vld [vmem:[%s1354_s21 + $0x20] sm:$0xff]  ;;  %v537_v48 = vld [vmem:[%s1354_s21 + $0x28] sm:$0xff]  ;;  %v447_v11 = vld [vmem:[%s1688_s5 + $0x10] sm:$0xff] }
  0x28   : > { %469 = vmatpush.msra.mxu0 %v456_v5  ;;  %988 = vmatpush.msra.mxu1 %v456_v5  ;;  %v525_v29 = vmul.f32 %v1376_v7, %v515_v24  ;;  %v543_v35 = vmul.f32 %v1380_v10, %v533_v25  ;;  %v531_v36 = vmul.f32 %v1376_v7, %v521_v26  ;;  %v450_v60 = vld [vmem:[%s1688_s5 + $0x28] sm:$0xff]  ;;  %v449_v1 = vld [vmem:[%s1688_s5 + $0x20] sm:$0xff] }
  0x29   : > { %989 = vmatpush.msra.mxu2 %v456_v5  ;;  %990 = vmatpush.msra.mxu3 %v456_v5  ;;  %v552_v23 = vadd.f32 %v544_v13, %v526_v12  ;;  %v550_v27 = vadd.f32 %v542_v20, %v524_v14  ;;  %v553_v28 = vadd.f32 %v545_v22, %v527_v21  ;;  %v446_v15 = vld [vmem:[%s1688_s5 + $0x8] sm:$0xff] }
  0x2a   : > { %470 = vmatpush.msra.mxu0 %v455_v6  ;;  %991 = vmatpush.msra.mxu1 %v455_v6  ;;  %v549_v40 = vmul.f32 %v1380_v10, %v539_v30  ;;  %v551_v44 = vadd.f32 %v543_v35, %v525_v29  ;;  %v530_v45 = vmul.f32 %v1376_v7, %v520_v31  ;;  %v441_v30 = vld [vmem:[%s1344_s15 + $0x20] sm:$0xff]  ;;  %v443_v31 = vld [vmem:[%s1344_s15 + $0x30] sm:$0xff] }
  0x2b   : > { %992 = vmatpush.msra.mxu2 %v455_v6  ;;  %993 = vmatpush.msra.mxu3 %v455_v6  ;;  %v562_v34 = vadd.f32 %v1393_v19, %v552_v23  ;;  %v560_v38 = vadd.f32 %v1393_v19, %v550_v27  ;;  %v563_v39 = vadd.f32 %v1393_v19, %v553_v28  ;;  %v448_v6 = vld [vmem:[%s1688_s5 + $0x18] sm:$0xff]  ;;  %v437_v27 = vld [vmem:[%s1344_s15] sm:$0xff]  ;;  %v439_v28 = vld [vmem:[%s1344_s15 + $0x10] sm:$0xff] }
  0x2c   : > { %471 = vmatpush.msra.mxu0 %v454_v18  ;;  %994 = vmatpush.msra.mxu1 %v454_v18  ;;  %v548_v46 = vmul.f32 %v1380_v10, %v538_v32  ;;  %v557_v51 = vadd.f32 %v549_v40, %v531_v36  ;;  %v528_v52 = vmul.f32 %v1376_v7, %v518_v37 }
  0x2d   : > { %995 = vmatpush.msra.mxu2 %v454_v18  ;;  %996 = vmatpush.msra.mxu3 %v454_v18  ;;  %v962_v43 = vmul.f32 -1.442695, %v562_v34  ;;  %v960_v49 = vmul.f32 -1.442695, %v560_v38  ;;  %v963_v50 = vmul.f32 -1.442695, %v563_v39  ;;  %v561_v54 = vadd.f32 %v1393_v19, %v551_v44 }
  0x2e   : > { %472 = vmatpush.msra.mxu0 %v453_v33  ;;  %997 = vmatpush.msra.mxu1 %v453_v33  ;;  %v556_v55 = vadd.f32 %v548_v46, %v530_v45  ;;  %v546_v56 = vmul.f32 %v1380_v10, %v536_v41  ;;  %v567_v57 = vadd.f32 %v1393_v19, %v557_v51 }
  0x2f   : > { %998 = vmatpush.msra.mxu2 %v453_v33  ;;  %999 = vmatpush.msra.mxu3 %v453_v33  ;;  %1085 = vpow2.f32 %v962_v43  ;;  %v529_v58 = vmul.f32 %v1376_v7, %v519_v47  ;;  %v547_v59 = vmul.f32 %v1380_v10, %v537_v48  ;;  %v961_v61 = vmul.f32 -1.442695, %v561_v54 }
  0x30   : > { %473 = vmatpush.msra.mxu0 %v452_v42  ;;  %1000 = vmatpush.msra.mxu1 %v452_v42  ;;  %1087 = vpow2.f32 %v960_v49  ;;  %v566_v62 = vadd.f32 %v1393_v19, %v556_v55  ;;  %v554_v63 = vadd.f32 %v546_v56, %v528_v52  ;;  %v967_v0 = vmul.f32 -1.442695, %v567_v57  ;;  %v438_v57 = vld [vmem:[%s1344_s15 + $0x8] sm:$0xff] }
  0x31   : > { %1001 = vmatpush.msra.mxu2 %v452_v42  ;;  %1002 = vmatpush.msra.mxu3 %v452_v42  ;;  %1089 = vpow2.f32 %v963_v50  ;;  %v555_v4 = vadd.f32 %v547_v59, %v529_v58  ;;  %v1232_v43 = vmov 0   ;;  %v440_v58 = vld [vmem:[%s1344_s15 + $0x18] sm:$0xff] }
  0x32   : > { %474 = vmatpush.msra.mxu0 %v451_v53  ;;  %1003 = vmatpush.msra.mxu1 %v451_v53  ;;  %1091 = vpow2.f32 %v961_v61  ;;  %v966_v2 = vmul.f32 -1.442695, %v566_v62  ;;  %v564_v3 = vadd.f32 %v1393_v19, %v554_v63  ;;  %v442_v63 = vld [vmem:[%s1344_s15 + $0x28] sm:$0xff] }
  0x33   : > { %1004 = vmatpush.msra.mxu2 %v451_v53  ;;  %1005 = vmatpush.msra.mxu3 %v451_v53  ;;  %1093 = vpow2.f32 %v967_v0  ;;  %v565_v13 = vadd.f32 %v1393_v19, %v555_v4  ;;  %v445_v19 = vld [vmem:[%s1688_s5] sm:$0xff]  ;;  %v444_v0 = vld [vmem:[%s1344_s15 + $0x38] sm:$0xff] }
  0x34   : > { %475 = vmatpush.msra.mxu0 %v450_v60  ;;  %1006 = vmatpush.msra.mxu1 %v450_v60  ;;  %v964_v9 = vmul.f32 -1.442695, %v564_v3  ;;  %1095 = vpow2.f32 %v966_v2 }
  0x35   : > { %v1086_v5 = vpop.eup %1085  ;;  %1007 = vmatpush.msra.mxu2 %v450_v60  ;;  %1008 = vmatpush.msra.mxu3 %v450_v60  ;;  %v965_v22 = vmul.f32 -1.442695, %v565_v13 }
  0x36   : > { %v1088_v7 = vpop.eup %1087  ;;  %476 = vmatpush.msra.mxu0 %v449_v1  ;;  %1009 = vmatpush.msra.mxu1 %v449_v1  ;;  %v1443_v8 = vadd.f32 1.0, %v1086_v5 }
  0x37   : > { %v1090_v10 = vpop.eup %1089  ;;  %1010 = vmatpush.msra.mxu2 %v449_v1  ;;  %1011 = vmatpush.msra.mxu3 %v449_v1  ;;  %v1448_v12 = vadd.f32 1.0, %v1088_v7 }
  0x38   : > { %477 = vmatpush.msra.mxu0 %v448_v6  ;;  %1012 = vmatpush.msra.mxu1 %v448_v6  ;;  %1097 = vrcp.f32 %v1443_v8  ;;  %v1092_v14 = vpop.eup %1091  ;;  %v1456_v17 = vadd.f32 1.0, %v1090_v10  ;;  %v639_v20 = vand.u32 2147483647, %v1443_v8  ;;  %v641_v23 = vand.u32 2147483648, %v1443_v8 }
  0x39   : > { %1013 = vmatpush.msra.mxu2 %v448_v6  ;;  %1014 = vmatpush.msra.mxu3 %v448_v6  ;;  %1099 = vrcp.f32 %v1448_v12  ;;  %v1094_v16 = vpop.eup %1093  ;;  %v1458_v18 = vadd.f32 1.0, %v1092_v14  ;;  %v609_v24 = vand.u32 2147483647, %v1448_v12  ;;  %v611_v25 = vand.u32 2147483648, %v1448_v12 }
  0x3a   : > { %478 = vmatpush.msra.mxu0 %v447_v11  ;;  %1015 = vmatpush.msra.mxu1 %v447_v11  ;;  %1101 = vpow2.f32 %v964_v9  ;;  %v1464_v21 = vadd.f32 1.0, %v1094_v16  ;;  %v1096_v26 = vpop.eup %1095  ;;  %vm635_vm0 = vweird.f32 %v1443_v8  ;;  %vm1483_vm1 = vcmp.eq.f32.partialorder %v639_v20, 8.507059e+37 }
  0x3b   : > { %1016 = vmatpush.msra.mxu2 %v447_v11  ;;  %1017 = vmatpush.msra.mxu3 %v447_v11  ;;  %1103 = vrcp.f32 %v1456_v17  ;;  %vm605_vm2 = vweird.f32 %v1448_v12  ;;  %v642_v36 = vor.u32 1.1754944e-38, %v641_v23  ;;  %vm1490_vm3 = vcmp.eq.f32.partialorder %v609_v24, 8.507059e+37 }
  0x3c   : > { %479 = vmatpush.msra.mxu0 %v446_v15  ;;  %1018 = vmatpush.msra.mxu1 %v446_v15  ;;  %1105 = vrcp.f32 %v1458_v18  ;;  %v612_v39 = vor.u32 1.1754944e-38, %v611_v25  ;;  %vm650_vm5 = vweird.f32 %v1456_v17  ;;  %v1496_v41 = vadd.f32 1.0, %v1096_v26 }
  0x3d   : > { %1019 = vmatpush.msra.mxu2 %v446_v15  ;;  %1020 = vmatpush.msra.mxu3 %v446_v15  ;;  %1107 = vrcp.f32 %v1464_v21  ;;  %v654_v45 = vand.u32 2147483647, %v1456_v17  ;;  %v656_v46 = vand.u32 2147483648, %v1456_v17  ;;  %vm620_vm8 = vweird.f32 %v1458_v18 }
  0x3e   : > { %v1473_v29 = vpop.eup %1097  ;;  %480 = vmatpush.msra.mxu0 %v445_v19  ;;  %1021 = vmatpush.msra.mxu1 %v445_v19  ;;  %1109 = vpow2.f32 %v965_v22  ;;  %v624_v55 = vand.u32 2147483647, %v1458_v18  ;;  %v626_v3 = vand.u32 2147483648, %v1458_v18  ;;  %v714_v24 = vand.u32 2147483647, %v1464_v21 }
  0x3f   : > { %v1479_v32 = vpop.eup %1099  ;;  %1022 = vmatpush.msra.mxu2 %v445_v19  ;;  %1023 = vmatpush.msra.mxu3 %v445_v19  ;;  %v631_v33 = vmul.f32 %v1473_v29, %v1443_v8  ;;  %vm636_vm4 = vweird.f32 %v1473_v29  ;;  %1111 = vrcp.f32 %v1496_v41  ;;  %vm1571_vm13 = vcmp.eq.f32.partialorder %v654_v45, 8.507059e+37 }
  0x40   : > { %v1102_v35 = vpop.eup %1101  ;;  %481 = vmatmul.f32.vlgmr.msra.gmra.mxu0 %v437_v27  ;;  %487 = vmatmul.f32.vlgmr.msra.gmra.mxu1 %v439_v28  ;;  %v601_v37 = vmul.f32 %v1479_v32, %v1448_v12  ;;  %vm606_vm6 = vweird.f32 %v1479_v32  ;;  %vm1517_vm7 = vmor %vm635_vm0, %vm636_vm4  ;;  %v657_v16 = vor.u32 1.1754944e-38, %v656_v46  ;;  %vm1584_vm15 = vcmp.eq.f32.partialorder %v624_v55, 8.507059e+37 }
  0x41   : > { %493 = vmatmul.f32.vlgmr.msra.gmra.mxu2 %v441_v30  ;;  %499 = vmatmul.f32.vlgmr.msra.gmra.mxu3 %v443_v31  ;;  %v632_v40 = vsub.f32 1.0, %v631_v33  ;;  %v1498_v42 = vpop.eup %1103  ;;  %v1509_v50 = vadd.f32 1.0, %v1102_v35  ;;  %vm1533_vm9 = vmor %vm605_vm2, %vm606_vm6  ;;  %vm710_vm0 = vweird.f32 %v1464_v21  ;;  %v627_v23 = vor.u32 1.1754944e-38, %v626_v3 }
  0x42   : > { %1082 = vset.pattern.permute.xlu1 %v1232_v43  ;;  %1081 = vset.pattern.permute.xlu0 %v1232_v43  ;;  %v602_v44 = vsub.f32 1.0, %v601_v37  ;;  %v1503_v47 = vpop.eup %1105  ;;  %v646_v49 = vmul.f32 %v1498_v42, %v1456_v17  ;;  %vm651_vm10 = vweird.f32 %v1498_v42  ;;  %v716_v25 = vand.u32 2147483648, %v1464_v21 }
  0x43   : > { %v633_v48 = vmul.f32 %v1473_v29, %v632_v40  ;;  %1083 = vset.pattern.permute.xlu2 %v1232_v43  ;;  %v1511_v51 = vpop.eup %1107  ;;  %v616_v54 = vmul.f32 %v1503_v47, %v1458_v18  ;;  %vm621_vm11 = vweird.f32 %v1503_v47  ;;  %1113 = vrcp.f32 %v1509_v50  ;;  %vm1559_vm12 = vmor %vm650_vm5, %vm651_vm10 }
  0x44   : > { %v603_v53 = vmul.f32 %v1479_v32, %v602_v44  ;;  %v1110_v56 = vpop.eup %1109  ;;  %v647_v61 = vsub.f32 1.0, %v646_v49  ;;  %v706_v62 = vmul.f32 %v1511_v51, %v1464_v21  ;;  %vm1579_vm14 = vmor %vm620_vm8, %vm621_vm11  ;;  %vm695_vm2 = vweird.f32 %v1496_v41 }
  0x45   : > { %v634_v59 = vadd.f32 %v1473_v29, %v633_v48  ;;  %v617_v2 = vsub.f32 1.0, %v616_v54  ;;  %v1564_v11 = vadd.f32 1.0, %v1110_v56  ;;  %v1566_v12 = vpop.eup %1111  ;;  %v699_v30 = vand.u32 2147483647, %v1496_v41 }
  0x46   : > { %v604_v1 = vadd.f32 %v1479_v32, %v603_v53  ;;  %v648_v5 = vmul.f32 %v1498_v42, %v647_v61  ;;  %v707_v6 = vsub.f32 1.0, %v706_v62  ;;  %v691_v22 = vmul.f32 %v1566_v12, %v1496_v41 }
  0x47   : > { %v638_v4 = vsel %vm1517_vm7, %v1473_v29, %v634_v59  ;;  %v618_v10 = vmul.f32 %v1503_v47, %v617_v2  ;;  %1115 = vrcp.f32 %v1564_v11  ;;  %v701_v31 = vand.u32 2147483648, %v1496_v41 }
  0x48   : > { %484 = vmatmul.f32.gmra.mxu0 %v438_v57  ;;  %490 = vmatmul.f32.gmra.mxu1 %v440_v58  ;;  %v643_v7 = vsel %vm1483_vm1, %v642_v36, %v638_v4  ;;  %v608_v8 = vsel %vm1533_vm9, %v1479_v32, %v604_v1  ;;  %v649_v14 = vadd.f32 %v1498_v42, %v648_v5  ;;  %v692_v28 = vsub.f32 1.0, %v691_v22  ;;  %v1084_v5 = vld [vmem:[%s1689_s6] ss:$0 sm:$0xff] }
  0x49   : > { %496 = vmatmul.f32.gmra.mxu2 %v442_v63  ;;  %502 = vmatmul.f32.gmra.mxu3 %v444_v0  ;;  %v613_v13 = vsel %vm1490_vm3, %v612_v39, %v608_v8  ;;  %v619_v19 = vadd.f32 %v1503_v47, %v618_v10  ;;  %v708_v18 = vmul.f32 %v1511_v51, %v707_v6  ;;  %v1114_v29 = vpop.eup %1113  ;;  %vm711_vm1 = vweird.f32 %v1511_v51 }
  0x4a   : > { %732 = vperm.xlu1 %1082, %v643_v7   ;;  %722 = vperm.xlu0 %1081, %v613_v13   ;;  %v653_v26 = vsel %vm1559_vm12, %v1498_v42, %v649_v14  ;;  %v693_v32 = vmul.f32 %v1566_v12, %v692_v28  ;;  %vm696_vm3 = vweird.f32 %v1566_v12  ;;  %v661_v33 = vmul.f32 %v1114_v29, %v1509_v50  ;;  %vm1617_vm5 = vmor %vm710_vm0, %vm711_vm1 }
  0x4b   : > { %v623_v27 = vsel %vm1579_vm14, %v1503_v47, %v619_v19  ;;  %vm665_vm4 = vweird.f32 %v1509_v50  ;;  %v658_v34 = vsel %vm1571_vm13, %v657_v16, %v653_v26  ;;  %v709_v36 = vadd.f32 %v1511_v51, %v708_v18  ;;  %vm1625_vm7 = vmor %vm695_vm2, %vm696_vm3 }
  0x4c   : > { %v628_v35 = vsel %vm1584_vm15, %v627_v23, %v623_v27  ;;  %v671_v37 = vand.u32 2147483648, %v1509_v50  ;;  %v694_v39 = vadd.f32 %v1566_v12, %v693_v32  ;;  %v662_v40 = vsub.f32 1.0, %v661_v33 }
  0x4d   : > { %vm666_vm6 = vweird.f32 %v1114_v29  ;;  %v669_v42 = vand.u32 2147483647, %v1509_v50  ;;  %v1116_v44 = vpop.eup %1115  ;;  %vm1629_vm8 = vcmp.eq.f32.partialorder %v714_v24, 8.507059e+37  ;;  %v717_v45 = vor.u32 1.1754944e-38, %v716_v25 }
  0x4e   : > { %v663_v46 = vmul.f32 %v1114_v29, %v662_v40  ;;  %vm1633_vm9 = vcmp.eq.f32.partialorder %v699_v30, 8.507059e+37  ;;  %v702_v48 = vor.u32 1.1754944e-38, %v701_v31  ;;  %vm1639_vm10 = vmor %vm665_vm4, %vm666_vm6  ;;  %v672_v49 = vor.u32 1.1754944e-38, %v671_v37 }
  0x4f   : > { %v676_v52 = vmul.f32 %v1116_v44, %v1564_v11  ;;  %v713_v53 = vsel %vm1617_vm5, %v1511_v51, %v709_v36  ;;  %v698_v54 = vsel %vm1625_vm7, %v1566_v12, %v694_v39  ;;  %vm670_vm11 = vcmp.eq.f32.partialorder %v669_v42, 8.507059e+37 }
  0x50   : > { %v664_v55 = vadd.f32 %v1114_v29, %v663_v46  ;;  %vm680_vm12 = vweird.f32 %v1564_v11  ;;  %vm681_vm13 = vweird.f32 %v1116_v44  ;;  %v686_v50 = vand.u32 2147483648, %v1564_v11 }
  0x51   : > { %v677_v56 = vsub.f32 1.0, %v676_v52  ;;  %v684_v58 = vand.u32 2147483647, %v1564_v11  ;;  %v718_v51 = vsel %vm1629_vm8, %v717_v45, %v713_v53  ;;  %v703_v59 = vsel %vm1633_vm9, %v702_v48, %v698_v54  ;;  %vm682_vm14 = vmor %vm680_vm12, %vm681_vm13 }
  0x52   : > { %737 = vperm.xlu1 %1082, %v658_v34   ;;  %727 = vperm.xlu0 %1081, %v628_v35   ;;  %v668_v57 = vsel %vm1639_vm10, %v1114_v29, %v664_v55  ;;  %v687_v63 = vor.u32 1.1754944e-38, %v686_v50  ;;  %v781_v52 = vlaneseq }
  0x53   : > { %v673_v60 = vsel %vm670_vm11, %v672_v49, %v668_v57  ;;  %v678_v61 = vmul.f32 %v1116_v44, %v677_v56  ;;  %vm685_vm15 = vcmp.eq.f32.partialorder %v684_v58, 8.507059e+37  ;;  %v783_v56 = vstv %s1217_s11 }
  0x54   : > { %742 = vperm.xlu2 %1083, %v673_v60   ;;  %v782_v55 = vshrl.u32 %v781_v52, 7 }
  0x55   : > { %v679_v62 = vadd.f32 %v1116_v44, %v678_v61  ;;  %v787_v61 = vld [vmem:[#allocation2] sm:$0xff] }
  0x56   : > { %vm784_vm0 = vcmp.eq.s32.totalorder %v782_v55, %v783_v56 }
  0x57   : > { %v683_v0 = vsel %vm682_vm14, %v1116_v44, %v679_v62 }
  0x58   : > { %v688_v1 = vsel %vm685_vm15, %v687_v63, %v683_v0  ;;  %v813_v0 = vld [vmem:[#allocation8 + $0x78] sm:$0xff] (%p791_p9) }
  0x59   : > { %818 = vmatpush.msra.mxu0 (%p791_p9), %v813_v0 }
  0x5a   : > { %757 = vperm.xlu1 %1082, %v718_v51   ;;  %752 = vperm.xlu0 %1081, %v703_v59   ;;  %v1233_v51 = vmov 0.0  }
  0x5b   : > { %v968_v59 = vsel %vm784_vm0, 1.0, %v1233_v51 }
  0x5c   : > { %747 = vperm.xlu2 %1083, %v688_v1   ;;  %v812_v1 = vld [vmem:[#allocation8 + $0x70] sm:$0xff] (%p791_p9) }
  0x5d   : > { %819 = vmatpush.msra.mxu0 (%p791_p9), %v812_v1 }
  0xae   : > { %v743_v16 = vpop.permute.xlu2 %742 }
  0xb6   : > { %v748_v40 = vpop.permute.xlu2 %747 }
  0xbc   : > { %v723_v4 = vpop.permute.xlu0 %722  ;;  %v733_v6 = vpop.permute.xlu1 %732 }
  0xbd   : > { %v482_v2 = vpop.f32.mrf.mxu0  ;;  %v488_v3 = vpop.f32.mrf.mxu1 }
  0xbe   : > { %v483_v7 = vadd.f32 %v1084_v5, %v482_v2  ;;  %v489_v8 = vadd.f32 %v1084_v5, %v488_v3  ;;  %v811_v2 = vld [vmem:[#allocation8 + $0x68] sm:$0xff] (%p791_p9)  ;;  %v810_v3 = vld [vmem:[#allocation8 + $0x60] sm:$0xff] (%p791_p9) }
  0xbf   : > { %820 = vmatpush.msra.mxu0 (%p791_p9), %v811_v2 }
  0xc0   : > { %v506_v13 = vmax.f32 %v483_v7, 0.0  ;;  %v508_v19 = vmax.f32 %v489_v8, 0.0  ;;  %v806_v7 = vld [vmem:[#allocation8 + $0x40] sm:$0xff] (%p791_p9)  ;;  %v805_v8 = vld [vmem:[#allocation8 + $0x38] sm:$0xff] (%p791_p9) }
  0xc1   : > { %821 = vmatpush.msra.mxu0 (%p791_p9), %v810_v3 }
  0xc2   : > { %v760_v23 = vmul.f32 %v723_v4, %v506_v13  ;;  %v762_v26 = vmul.f32 %v733_v6, %v508_v19  ;;  %v809_v4 = vld [vmem:[#allocation8 + $0x58] sm:$0xff] (%p791_p9)  ;;  %v807_v6 = vld [vmem:[#allocation8 + $0x48] sm:$0xff] (%p791_p9)  ;;  %v800_v13 = vld [vmem:[#allocation8 + $0x10] sm:$0xff] (%p791_p9) }
  0xc3   : > { %822 = vmatpush.msra.mxu0 (%p791_p9), %v809_v4  ;;  %v1117_v19 = vld [vmem:[%s1691_s8] ss:$0 sm:$0xff] (%p791_p9) }
  0xc4   : > { %v494_v9 = vpop.f32.mrf.mxu2  ;;  %v500_v10 = vpop.f32.mrf.mxu3 }
  0xc5   : > { %v485_v11 = vpop.f32.mrf.mxu0  ;;  %v491_v12 = vpop.f32.mrf.mxu1  ;;  %v495_v20 = vadd.f32 %v1084_v5, %v494_v9  ;;  %v501_v28 = vadd.f32 %v1084_v5, %v500_v10  ;;  %v804_v9 = vld [vmem:[#allocation8 + $0x30] sm:$0xff] (%p791_p9)  ;;  %v803_v10 = vld [vmem:[#allocation8 + $0x28] sm:$0xff] (%p791_p9) }
  0xc6   : > { %v486_v14 = vadd.f32 %v1084_v5, %v485_v11  ;;  %v492_v15 = vadd.f32 %v1084_v5, %v491_v12  ;;  %v728_v17 = vpop.permute.xlu0 %727  ;;  %v738_v25 = vpop.permute.xlu1 %737  ;;  %v802_v11 = vld [vmem:[#allocation8 + $0x20] sm:$0xff] (%p791_p9)  ;;  %v801_v12 = vld [vmem:[#allocation8 + $0x18] sm:$0xff] (%p791_p9) }
  0xc7   : > { %v510_v27 = vmax.f32 %v495_v20, 0.0  ;;  %v512_v38 = vmax.f32 %v501_v28, 0.0 }
  0xc8   : > { %v507_v22 = vmax.f32 %v486_v14, 0.0  ;;  %v509_v24 = vmax.f32 %v492_v15, 0.0  ;;  %v799_v15 = vld [vmem:[#allocation8 + $0x8] sm:$0xff] (%p791_p9) }
  0xc9   : > { %v764_v37 = vmul.f32 %v743_v16, %v510_v27  ;;  %v798_v16 = vld [vmem:[#allocation8] sm:$0xff] (%p791_p9) }
  0xca   : > { %v761_v18 = vmul.f32 %v728_v17, %v507_v22  ;;  %v763_v33 = vmul.f32 %v738_v25, %v509_v24 }
  0xcc   : > { %v768_v29 = vadd.f32 %v761_v18, %v760_v23  ;;  %v497_v30 = vpop.f32.mrf.mxu2  ;;  %v503_v31 = vpop.f32.mrf.mxu3 }
  0xcd   : > { %v498_v32 = vadd.f32 %v1084_v5, %v497_v30  ;;  %v504_v35 = vadd.f32 %v1084_v5, %v503_v31  ;;  %v808_v5 = vld [vmem:[#allocation8 + $0x50] sm:$0xff] (%p791_p9) }
  0xce   : > { %v769_v34 = vadd.f32 %v768_v29, %v762_v26  ;;  %v753_v42 = vpop.permute.xlu0 %752  ;;  %v758_v47 = vpop.permute.xlu1 %757  ;;  %823 = vmatpush.msra.mxu0 (%p791_p9), %v808_v5 }
  0xcf   : > { %v511_v36 = vmax.f32 %v498_v32, 0.0  ;;  %v513_v21 = vmax.f32 %v504_v35, 0.0  ;;  %v766_v45 = vmul.f32 %v753_v42, %v512_v38 }
  0xd0   : > { %v770_v39 = vadd.f32 %v769_v34, %v763_v33  ;;  %824 = vmatpush.msra.mxu0 (%p791_p9), %v807_v6 }
  0xd1   : > { %v765_v43 = vmul.f32 %v748_v40, %v511_v36  ;;  %v767_v48 = vmul.f32 %v758_v47, %v513_v21 }
  0xd2   : > { %v771_v44 = vadd.f32 %v770_v39, %v764_v37  ;;  %825 = vmatpush.msra.mxu0 (%p791_p9), %v806_v7 }
  0xd4   : > { %v772_v46 = vadd.f32 %v771_v44, %v765_v43  ;;  %826 = vmatpush.msra.mxu0 (%p791_p9), %v805_v8 }
  0xd6   : > { %v773_v41 = vadd.f32 %v772_v46, %v766_v45  ;;  %827 = vmatpush.msra.mxu0 (%p791_p9), %v804_v9 }
  0xd8   : > { %v774_v49 = vadd.f32 %v773_v41, %v767_v48  ;;  %828 = vmatpush.msra.mxu0 (%p791_p9), %v803_v10 }
  0xda   : > { %v775_v53 = vrot.slane %v774_v49, 4  ;;  %829 = vmatpush.msra.mxu0 (%p791_p9), %v802_v11 }
  0xdc   : > { %v776_v54 = vadd.f32 %v775_v53, %v774_v49  ;;  %830 = vmatpush.msra.mxu0 (%p791_p9), %v801_v12 }
  0xde   : > { %v777_v50 = vrot.slane %v776_v54, 2  ;;  %831 = vmatpush.msra.mxu0 (%p791_p9), %v800_v13 }
  0xe0   : > { %v778_v57 = vadd.f32 %v777_v50, %v776_v54  ;;  %832 = vmatpush.msra.mxu0 (%p791_p9), %v799_v15 }
  0xe2   : > { %v779_v58 = vrot.slane %v778_v57, 1  ;;  %833 = vmatpush.msra.mxu0 (%p791_p9), %v798_v16 }
  0xe4   : > { %v780_v60 = vadd.f32 %v779_v58, %v778_v57 }
  0xe6   : > { %v788_v62 = vmul.f32 %v968_v59, %v780_v60  ;;  %795 = sbr.rel (!%p791_p9) target bundleno = 373 (0x175), region = 72 }
  0xe8   : > { %v789_v63 = vadd.f32 %v788_v62, %v787_v61 }
  0xea   : > { %790 = vst [vmem:[#allocation2] sm:$0xff] %v789_v63 }
  0xf1   : > { %v796_v14 = vld [vmem:[#allocation2] sm:$0xff] }
  0xf2   : > { %v797_v17 = vmul.f32 0.015625, %v796_v14 }
  0xf4   : > { %834 = vmatmul.f32.vlgmr.msra.gmra.mxu0 %v797_v17 }
 0x171   : > { %v835_v20 = vpop.f32.mrf.mxu0 }
 0x172   : > { %v836_v22 = vadd.f32 %v1117_v19, %v835_v20 }
 0x174   : > { %838 = vst [vmem:[#allocation9] sm:$0xff] %v836_v22 }
 0x175 PF: > { %p1047_p10 = scmp.eq.s32.totalorder %s944_s4, 1  ;;  %s847_s19 = sshll.u32 %s1692_s9, 4  ;;  %s848_s19 = int_to_ptr.hbm [resolvable:$true] %s847_s19 }
 0x176   : > { %s1234_s21 = smov [#allocation9]  }
 0x177   : > { %s845_s10 = sshll.u32 %s1234_s21, 4  ;;  %s846_s10 = int_to_ptr.vmem [resolvable:$true] %s845_s10 }
 0x178   : > { %1033 = dma.vmem_to_hbm [thread:$0]  (%p1047_p10), %s846_s10, 128, %s848_s19, [#allocation6]  }
 0x179   : > { %1212 = dma.done.wait (%p1047_p10), [#allocation6], 128  }
 0x17a   : > { %1214 = vsyncadd (%p1047_p10), [#allocation6], 4294967168 }
 0x17b PF: > { %s23_s13 = sadd.s32 1, %s1225_s13   ;;  %s1721_s11 = smov %s1221_s12 }
 0x17c   : > { %p20_p11 = scmp.ge.s32.totalorder %s23_s13, 4   ;;  %s1722_s12 = smov %s1724_s14 }
 0x17e   :  { %22 = sbr.rel (!%p20_p11) target bundleno = 6 (0x6), region = 107 }
 0x183   :  { %861 = vsyncpa [#allocation5], 1 }
 0x184   :  { %863 = vsyncpa [#allocation5 + $0x1], 1 }
 0x185   :  { %864 = vsyncpa [#allocation6], 1 }
 0x186   :  { %866 = vsyncpa [#allocation6 + $0x1], 1 }
 0x187   :  { %867 = vsyncpa [#allocation7], 1 }
 0x188   :  { %869 = vsyncpa [#allocation7 + $0x1], 1 }

</bundles_post_ra>
